<compile_context>
chip_gen: v7x
topology: tpu7x:2x2x1
jax: 0.10.0
libtpu: 0.0.40
codegen_flags: <defaults>
</compile_context>

<pallas_src>
import functools

import jax
import jax.numpy as jnp
import numpy as np
from jax.experimental import pallas as pl
from jax.experimental.pallas import tpu as pltpu


def _softmax_temp_kernel(x_ref, out_ref, *, temp):
    """One (TB, C, TP) tile: exp(clamp(x*temp)) normalized over the channel axis."""
    x = x_ref[...].astype(jnp.float32)                 # native-dtype load, f32 math
    z = jnp.clip(x * temp, -88.7, 88.7)                # VALU
    e = jnp.exp(z)                                     # EUP (transcendental slot)
    denom = jnp.sum(e, axis=1, keepdims=True)          # (TB, 1, TP) sublane reduce (XLU)
    out_ref[...] = (e / denom).astype(out_ref.dtype)   # exact divide; lane-dense store


def _pick_tiles(B, C, P_pad, itemsize, block_budget=4 * 1024 * 1024):
    """Pick (TB, TP) so one block is as large as possible within ~block_budget bytes.

    TP is a multiple of 128 that divides P_pad; TB divides B.  Keeps >= 2 grid
    steps whenever B >= 2 so both v7x TensorCores get work.
    """
    n128 = P_pad // 128
    best = 1
    for d in range(1, n128 + 1):
        if n128 % d == 0 and C * (128 * d) * itemsize <= block_budget:
            best = d
    TP = 128 * best

    TB = 1
    for d in range(1, B + 1):
        if B % d == 0 and d * C * TP * itemsize <= block_budget:
            TB = d

    # Avoid collapsing the grid to a single step when there is batch to split.
    if (B // TB) * (P_pad // TP) < 2 and B >= 2:
        for d in range(B // 2, 0, -1):
            if B % d == 0:
                TB = d
                break
    return TB, TP


def softmax_temp(x, temp):
    """Pallas TPU implementation of SoftMaxTemp.forward for (B, C, ...) inputs."""
    x = jnp.asarray(x)
    orig_shape = x.shape
    orig_dtype = x.dtype
    B, C = x.shape[0], x.shape[1]
    P = int(np.prod(x.shape[2:])) if x.ndim > 2 else 1
    x3 = x.reshape(B, C, P)

    # Pad the lane dimension to a multiple of 128 (unmasked stores, flexible tiling).
    P_pad = ((P + 127) // 128) * 128
    if P_pad != P:
        x3 = jnp.pad(x3, ((0, 0), (0, 0), (0, P_pad - P)))

    itemsize = jnp.dtype(orig_dtype).itemsize
    TB, TP = _pick_tiles(B, C, P_pad, itemsize)
    grid = (B // TB, P_pad // TP)

    out3 = pl.pallas_call(
        functools.partial(_softmax_temp_kernel, temp=float(temp)),
        out_shape=jax.ShapeDtypeStruct((B, C, P_pad), orig_dtype),
        grid=grid,
        in_specs=[pl.BlockSpec((TB, C, TP), lambda b, i: (b, 0, i))],
        out_specs=pl.BlockSpec((TB, C, TP), lambda b, i: (b, 0, i)),
        compiler_params=pltpu.CompilerParams(
            dimension_semantics=("parallel", "parallel"),
            vmem_limit_bytes=32 * 1024 * 1024),
    )(x3)

    if P_pad != P:
        out3 = out3[:, :, :P]
    return out3.reshape(orig_shape)


def reference_softmax_temp(x, temp):
    """Pure-JAX mirror of the PyTorch forward for validation."""
    y = jnp.exp(jnp.clip(jnp.asarray(x, jnp.float32) * temp, -88.7, 88.7))
    return y / jnp.sum(y, axis=1, keepdims=True)


if __name__ == "__main__":
    key = jax.random.PRNGKey(0)
    B, C, H, W = 2, 4, 16, 16
    temp = 1.7

    x = jax.random.normal(key, (B, C, H, W), dtype=jnp.float32) * 3.0

    out = softmax_temp(x, temp)
    out = jax.block_until_ready(out)

    ref = reference_softmax_temp(x, temp)
    ref = jax.block_until_ready(ref)

    assert out.shape == (B, C, H, W), out.shape
    # Exact divide inside the kernel -> tight tolerances now hold.
    assert np.allclose(np.asarray(out), np.asarray(ref), rtol=1e-5, atol=1e-6), (
        np.max(np.abs(np.asarray(out) - np.asarray(ref))))
    # Rows must sum to ~1 over the channel axis.
    sums = np.sum(np.asarray(out), axis=1)
    assert np.allclose(sums, 1.0, rtol=1e-5, atol=1e-6), sums
    print("KERNEL_OK")
</pallas_src>

<mosaic_0001>
module attributes {stable_mosaic.version = 11 : i64} {
  func.func @_softmax_temp_kernel(%arg0: i32, %arg1: i32, %arg2: memref<1x4x256xf32, #tpu.memory_space<vmem>>, %arg3: memref<1x4x256xf32, #tpu.memory_space<vmem>>) attributes {dimension_semantics = [#tpu.dimension_semantics<parallel>, #tpu.dimension_semantics<parallel>], iteration_bounds = array<i64: 2, 1>, scalar_prefetch = 0 : i64, scratch_operands = 0 : i64, tpu.core_type = #tpu.core_type<tc>, window_params = [{transform_indices = @transform_0, window_bounds = array<i64: 1, 4, 256>}, {transform_indices = @transform_1, window_bounds = array<i64: 1, 4, 256>}]} {
    %c0 = arith.constant 0 : index
    %c0_0 = arith.constant 0 : index
    %c0_1 = arith.constant 0 : index
    %0 = vector.load %arg2[%c0, %c0_0, %c0_1] : memref<1x4x256xf32, #tpu.memory_space<vmem>>, vector<1x4x256xf32>
    %cst = arith.constant 1.700000e+00 : f32
    %1 = vector.broadcast %cst : f32 to vector<1x4x256xf32>
    %2 = arith.mulf %0, %1 : vector<1x4x256xf32>
    %cst_2 = arith.constant -88.6999969 : f32
    %cst_3 = arith.constant 88.6999969 : f32
    %3 = vector.broadcast %cst_2 : f32 to vector<1x4x256xf32>
    %4 = arith.maximumf %3, %2 : vector<1x4x256xf32>
    %5 = vector.broadcast %cst_3 : f32 to vector<1x4x256xf32>
    %6 = arith.minimumf %5, %4 : vector<1x4x256xf32>
    %7 = math.exp %6 : vector<1x4x256xf32>
    %cst_4 = arith.constant dense<0.000000e+00> : vector<1x256xf32>
    %8 = vector.multi_reduction <add>, %7, %cst_4 [1] : vector<1x4x256xf32> to vector<1x256xf32>
    %9 = vector.shape_cast %8 : vector<1x256xf32> to vector<1x1x256xf32>
    %10 = vector.broadcast %9 : vector<1x1x256xf32> to vector<1x4x256xf32>
    %11 = arith.divf %7, %10 : vector<1x4x256xf32>
    %c0_5 = arith.constant 0 : index
    %c0_6 = arith.constant 0 : index
    %c0_7 = arith.constant 0 : index
    %12 = vector.load %arg3[%c0_5, %c0_6, %c0_7] : memref<1x4x256xf32, #tpu.memory_space<vmem>>, vector<1x4x256xf32>
    tpu.vector_store %arg3[%c0_5, %c0_6, %c0_7], %11 {strides = array<i32>} : memref<1x4x256xf32, #tpu.memory_space<vmem>>, vector<1x4x256xf32>,
    return
  }
  func.func @transform_0(%arg0: i32, %arg1: i32) -> (i32, i32, i32) {
    %c0_i32 = arith.constant 0 : i32
    %c0_i32_0 = arith.constant 0 : i32
    return %arg0, %c0_i32, %arg1 : i32, i32, i32
  }
  func.func @transform_1(%arg0: i32, %arg1: i32) -> (i32, i32, i32) {
    %c0_i32 = arith.constant 0 : i32
    %c0_i32_0 = arith.constant 0 : i32
    return %arg0, %c0_i32, %arg1 : i32, i32, i32
  }
}

</mosaic_0001>

<bundles_post_ra>
// kernel: tpu_custom_call.1
= control target key start
LH: loop header
LB: loop body
LE: loop exit
PB: predicated region body
PF: predicated region fallthrough
CT: control target
= control target key end

     0   :  { %6 = vsyncpa [#allocation3], 0  ;;  %s667_s0 = inlined_call_operand.hbm [shape: f32[2,4,256], index: 0, kind: input, shape index: {}]   ;;  %s668_s1 = inlined_call_operand.hbm [shape: f32[2,4,256], index: 1, kind: output, shape index: {}]  }
   0x1   :  { %8 = vsyncpa [#allocation3 + $0x1], 0 }
   0x2   :  { %9 = vsyncpa [#allocation4], 0 }
   0x3   :  { %11 = vsyncpa [#allocation4 + $0x1], 0  ;;  %s495_s6 = smov 0   ;;  %s497_s7 = smov 0  }
   0x4   :  { %s499_s8 = smov 0   ;;  %s501_s9 = smov 0  }
   0x5   :  { %s503_s10 = smov 0   ;;  %s505_s11 = smov 0  }
   0x6 LB: > { %s285_s12 = sadd.s32 4294967295, %s481_s11   ;;  %s286_s13 = sadd.s32 4294967294, %s481_s11   ;;  %s481_s11 = sphi %s505_s11, %s17_s11   ;;  %s477_s10 = sphi %s503_s10, %s684_s10   ;;  %s473_s9 = sphi %s501_s9, %s683_s9   ;;  %s469_s8 = sphi %s499_s8, %s682_s8   ;;  %s465_s7 = sphi %s497_s7, %s681_s7   ;;  %s461_s6 = sphi %s495_s6, %s680_s6  }
   0x7   : > { %s29_s14 = sadd.s32 1, %s477_s10  ;;  %s38_s15 = sadd.s32 1, %s469_s8 }
   0x8   : > { %p31_p0 = scmp.ge.s32.totalorder %s29_s14, 2  ;;  %p45_p1 = scmp.ne.s32.totalorder %s469_s8, %s465_s7 }
   0x9   : > { %p46_p2 = scmp.eq.s32.totalorder %s481_s11, 0  ;;  %p51_p3 = scmp.ne.s32.totalorder %s465_s7, %s461_s6 }
   0xa   : > { %s686_s14 = smov (%p31_p0, %s29_s14), 0  ;;  %p52_p5 = scmp.eq.s32.totalorder %s285_s12, 0 }
   0xb   : > { %p536_p4 = por %p46_p2, %p45_p1  ;;  %s33_s17 = ssub.s32 %s477_s10, %s686_s14 }
   0xc   : > { %p77_p6 = scmp.eq.s32.totalorder %s285_s12, 1  ;;  %p36_p7 = scmp.eq.s32.totalorder %s33_s17, 0 }
   0xd   : > { %p542_p8 = por %p52_p5, %p51_p3  ;;  %p83_p10 = scmp.eq.s32.totalorder %s286_s13, 1 }
   0xe   : > { %p546_p9 = por %p77_p6, %p45_p1  ;;  %p315_p13 = scmp.lt.s32.totalorder %s481_s11, 2 }
   0xf   : > { %s551_s20 = scalar_select %p36_p7, %s469_s8, %s38_s15  }
  0x10   : > { %s672_s19 = scalar_select %p546_p9, 1, 0 }
  0x11   : > { %p553_p11 = por %p83_p10, %p51_p3  ;;  %s103_s22 = sand.u32 1, %s469_s8  }
  0x12   : > { %s289_s23 = sshll.u32 %s103_s22, 3  ;;  %s301_s24 = sshll.u32 %s477_s10, 7 }
  0x13   : > { %s673_s21 = scalar_select %p553_p11, 1, 0 }
  0x14   : > { %s564_s27 = scalar_lea.hbm %s667_s0, %s301_s24  ;;  %s107_s28 = scalar_lea.vmem [#allocation2], %s289_s23 }
  0x15   : > { %s117_s29 = sshll.u32 %s107_s28, 4  ;;  %p570_p0 = pnand %p315_p13, %p536_p4  ;;  %s566_s29 = int_to_ptr.vmem [resolvable:$true] %s117_s29 }
  0x16   : > { %s104_s2 = scalar_lea.sflag [#allocation3], %s103_s22  ;;  %s369_s3 = scalar_lea.hbm %s564_s27, 128 }
  0x17   : > { %p370_p3 = scmp.ne.s32.totalorder %s564_s27, %s369_s3  ;;  %p371_p5 = pneg %p570_p0 }
  0x18   : > { %s374_s12 = scalar_lea.hbm %s667_s0, 256  ;;  %p375_p4 = scmp.lt.u32.totalorder %s564_s27, %s667_s0 }
  0x19   : > { %p372_p6 = pnand %p371_p5, %p370_p3  ;;  %p376_p10 = scmp.lt.u32.totalorder %s374_s12, %s369_s3 }
  0x1a   : > { %p378_p12 = scmp.lt.u32.totalorder %s369_s3, %s564_s27 }
  0x1b   : > { %p373_p7 = pneg %p372_p6  ;;  %p377_p13 = por %p376_p10, %p375_p4 }
  0x1d   : > { %p379_p1 = por %p378_p12, %p377_p13 }
  0x1f   : > { %p380_p2 = pnand %p379_p1, %p373_p7 }
  0x21   : > { %383 = shalt.err (!%p380_p2)
}
  0x22   : > { %s384_s16 = scalar_lea.vmem %s566_s29, 128  ;;  %s483_s17 = smov [#allocation2]  }
  0x23   : > { %p385_p3 = scmp.ne.s32.totalorder %s566_s29, %s384_s16  ;;  %s389_s22 = sshll.u32 %s483_s17, 4  ;;  %s390_s22 = int_to_ptr.vmem [resolvable:$false] %s389_s22 }
  0x24   : > { %s391_s23 = scalar_lea.vmem %s390_s22, 256  ;;  %p392_p9 = scmp.lt.s32.totalorder %s566_s29, %s390_s22 }
  0x25   : > { %p387_p6 = pnand %p385_p3, %p371_p5  ;;  %p393_p4 = scmp.lt.s32.totalorder %s391_s23, %s384_s16 }
  0x27   : > { %p388_p11 = pneg %p387_p6  ;;  %p394_p10 = por %p393_p4, %p392_p9 }
  0x29   : > { %p395_p12 = pnand %p394_p10, %p388_p11 }
  0x2b   : > { %398 = shalt.err (!%p395_p12)
}
  0x2c   : > { %310 = dma.hbm_to_vmem [thread:$0]  (!%p570_p0), %s564_s27, 128, %s566_s29, %s104_s2  }
  0x2d   : > { %p675_p1 = scmp.lt.s32.totalorder %s481_s11, 3  ;;  %p676_p2 = scmp.ge.s32.totalorder %s481_s11, 1 }
  0x2f   : > { %p123_p5 = pnand %p676_p2, %p675_p1 }
  0x30   : > { %s606_s24 = sand.u32 (!%p123_p5), 1, %s465_s7  }
  0x31   : > { %126 = sbr.rel (%p123_p5) target bundleno = 119 (0x77), region = 24  ;;  %s293_s25 = sshll.u32 (!%p123_p5), %s606_s24, 3 }
  0x32   : > { %s129_s26 = scalar_lea.sflag (!%p123_p5), [#allocation3], %s606_s24  ;;  %s132_s28 = scalar_lea.vmem (!%p123_p5), [#allocation2], %s293_s25 }
  0x38   : > { %452 = dma.done.wait (%p542_p8), %s129_s26, 128  }
  0x39   : > { %454 = vsyncadd (%p542_p8), %s129_s26, 4294967168  ;;  %v153_v0 = vld [vmem:[%s132_s28] sm:$0xff]  ;;  %vm162_vm0 = vcmask 1043456   ;;  %s150_s18 = scalar_lea.vmem [#allocation5], %s293_s25  ;;  %s302_s29 = sshll.u32 %s473_s9, 7 }
  0x3a   : > { %v154_v1 = vmul.f32 1.7, %v153_v0  ;;  %s201_s27 = sshll.u32 %s150_s18, 4  ;;  %s620_s3 = scalar_lea.hbm %s668_s1, %s302_s29  ;;  %s615_s27 = int_to_ptr.vmem [resolvable:$true] %s201_s27 }
  0x3b   : > { %s185_s4 = scalar_lea.sflag [#allocation4], %s606_s24  ;;  %s399_s5 = scalar_lea.vmem %s615_s27, 128 }
  0x3c   : > { %v295_v2 = vclamps-f32 %v154_v1, 88.7  ;;  %p400_p8 = scmp.ne.s32.totalorder %s615_s27, %s399_s5  ;;  %p677_p9 = scmp.ne.s32.totalorder %s672_s19, 0 }
  0x3d   : > { %s484_s9 = smov [#allocation5]  }
  0x3e   : > { %v157_v3 = vmul.f32 1.442695, %v295_v2  ;;  %p401_p11 = pnand %p400_p8, %p677_p9  ;;  %s403_s12 = sshll.u32 %s484_s9, 4  ;;  %s404_s12 = int_to_ptr.vmem [resolvable:$false] %s403_s12 }
  0x3f   : > { %s405_s13 = scalar_lea.vmem %s404_s12, 256  ;;  %p406_p7 = scmp.lt.s32.totalorder %s615_s27, %s404_s12 }
  0x40   : > { %365 = vpow2.f32 %v157_v3  ;;  %p402_p0 = pneg %p401_p11  ;;  %p407_p13 = scmp.lt.s32.totalorder %s405_s13, %s399_s5 }
  0x42   : > { %p408_p3 = por %p407_p13, %p406_p7 }
  0x44   : > { %p409_p6 = pnand %p408_p3, %p402_p0 }
  0x4a   : > { %v366_v4 = vpop.eup %365 }
  0x4b   : > { %v160_v5 = vcombine.high %v366_v4, %v366_v4  ;;  %v163_v6 = vsel %vm162_vm0, %v366_v4, 0.0 }
  0x4c   : > { %v164_v7 = vrot.slane %v163_v6, 4 }
  0x4d   : > { %v170_v8 = vsel %vm162_vm0, %v160_v5, 0.0 }
  0x4e   : > { %v165_v9 = vadd.f32 %v164_v7, %v163_v6  ;;  %v171_v10 = vrot.slane %v170_v8, 4 }
  0x50   : > { %v166_v11 = vrot.slane %v165_v9, 2  ;;  %v172_v12 = vadd.f32 %v171_v10, %v170_v8 }
  0x52   : > { %v167_v13 = vadd.f32 %v166_v11, %v165_v9  ;;  %v173_v14 = vrot.slane %v172_v12, 2 }
  0x54   : > { %v168_v15 = vrot.slane %v167_v13, 1  ;;  %v174_v16 = vadd.f32 %v173_v14, %v172_v12 }
  0x56   : > { %v169_v17 = vadd.f32 %v168_v15, %v167_v13  ;;  %v175_v18 = vrot.slane %v174_v16, 1 }
  0x58   : > { %v176_v19 = vadd.f32 %v175_v18, %v174_v16 }
  0x5a   : > { %v179_v20 = vcombine.low %v169_v17, %v176_v19 }
  0x5c   : > { %367 = vrcp.f32 %v179_v20 }
  0x66   : > { %v368_v21 = vpop.eup %367 }
  0x67   : > { %v182_v22 = vmul.f32 %v368_v21, %v366_v4 }
  0x69   : > { %183 = vst [vmem:[%s150_s18] sm:$0xff] %v182_v22 }
  0x6a   : > { %412 = shalt.err (!%p409_p6)
}
  0x6b   : > { %s413_s15 = scalar_lea.hbm %s620_s3, 128  ;;  %s417_s22 = scalar_lea.hbm %s668_s1, 256 }
  0x6c   : > { %p414_p4 = scmp.ne.s32.totalorder %s620_s3, %s413_s15  ;;  %p418_p1 = scmp.lt.u32.totalorder %s620_s3, %s668_s1 }
  0x6d   : > { %p419_p2 = scmp.lt.u32.totalorder %s417_s22, %s413_s15  ;;  %p421_p8 = scmp.lt.u32.totalorder %s413_s15, %s620_s3 }
  0x6e   : > { %p415_p10 = pnand %p414_p4, %p677_p9 }
  0x6f   : > { %p420_p5 = por %p419_p2, %p418_p1 }
  0x70   : > { %p416_p12 = pneg %p415_p10 }
  0x71   : > { %p422_p11 = por %p421_p8, %p420_p5 }
  0x73   : > { %p423_p0 = pnand %p422_p11, %p416_p12 }
  0x75   : > { %426 = shalt.err (!%p423_p0)
}
  0x76   : > { %305 = dma.vmem_to_hbm [thread:$0]  (%p677_p9), %s615_s27, 128, %s620_s3, %s185_s4  }
  0x77 PF: > { %s213_s25 = sand.u32 1, %s461_s6   ;;  %p678_p7 = scmp.ne.s32.totalorder %s673_s21, 0 }
  0x78   : > { %p679_p13 = scmp.ge.s32.totalorder %s481_s11, 2  ;;  %s214_s26 = scalar_lea.sflag [#allocation4], %s213_s25 }
  0x7a   : > { %p312_p3 = pnand %p679_p13, %p678_p7 }
  0x7c   : > { %456 = dma.done.wait (!%p312_p3), %s214_s26, 128  }
  0x7d   : > { %458 = vsyncadd (!%p312_p3), %s214_s26, 4294967168  ;;  %s17_s11 = sadd.s32 1, %s481_s11   ;;  %s680_s6 = smov %s465_s7 }
  0x7e   : > { %p14_p6 = scmp.ge.s32.totalorder %s17_s11, 4   ;;  %s681_s7 = smov %s469_s8 }
  0x7f   : > { %s682_s8 = smov %s551_s20  ;;  %s683_s9 = smov %s477_s10 }
  0x80   : > { %s684_s10 = smov %s686_s14  ;;  %16 = sbr.rel (!%p14_p6) target bundleno = 6 (0x6), region = 69 }
  0x87   :  { %219 = vsyncpa [#allocation3], 1 }
  0x88   :  { %221 = vsyncpa [#allocation3 + $0x1], 1 }
  0x89   :  { %222 = vsyncpa [#allocation4], 1 }
  0x8a   :  { %224 = vsyncpa [#allocation4 + $0x1], 1 }

</bundles_post_ra>
